<compile_context>
chip_gen: v7x
topology: tpu7x:2x2x1
jax: 0.10.0
libtpu: 0.0.40
codegen_flags: <defaults>
</compile_context>

<pallas_src>
import jax
import jax.numpy as jnp
from jax import lax
from jax.experimental import pallas as pl
from jax.experimental.pallas import tpu as pltpu


_BN_EPS = 1e-5          # torch.nn.BatchNorm1d default eps
_LEAKY_SLOPE = 0.01     # torch.nn.LeakyReLU default negative_slope
# Above this bf16 weight footprint the resident design should switch to
# per-layer streaming (v7x: 64 MiB physical VMEM, 32 MiB default scoped).
_RESIDENT_WEIGHT_BYTES_LIMIT = 16 * 1024 * 1024


def _make_fused_kernel(num_layers):
    """Fused kernel for `num_layers` _BasicLinear blocks.

    Kernel refs: x_ref, then per layer (w_ref[bf16, (out,in)], b_ref, gamma_ref,
    beta_ref), then o_ref.  Every ref is a whole array resident in VMEM.
    """
    def kernel(*refs):
        x_ref = refs[0]
        o_ref = refs[-1]
        params = refs[1:-1]

        h = x_ref[...].astype(jnp.float32)
        for l in range(num_layers):
            w_ref, b_ref, g_ref, be_ref = params[4 * l: 4 * l + 4]
            # Linear: bf16 operands, MXU-native NT contraction, f32 accumulation,
            # bias folded into the same add.  Output (B, out) is lane-dense.
            h = lax.dot_general(
                h.astype(jnp.bfloat16), w_ref[...],
                dimension_numbers=(((1,), (1,)), ((), ())),
                preferred_element_type=jnp.float32) + b_ref[...]
            # BatchNorm1d, training-mode batch statistics (biased var, eps=1e-5),
            # folded into one per-feature scale/shift.  rsqrt goes to the EUP.
            mean = jnp.mean(h, axis=0, keepdims=True)
            var = jnp.mean(jnp.square(h - mean), axis=0, keepdims=True)
            scale = g_ref[...] * lax.rsqrt(var + _BN_EPS)
            shift = be_ref[...] - mean * scale
            h = h * scale + shift
            # LeakyReLU (slope 0.01 < 1): single vmax + one mul.
            h = jnp.maximum(h, _LEAKY_SLOPE * h)
            # Dropout: module default p=0.0 -> identity.
            # (p > 0 would use pltpu.prng_seed / pltpu.prng_random_bits.)
        o_ref[...] = h.astype(o_ref.dtype)

    return kernel


def linear_block_sequence(conv_features, layer_params, max_lines):
    """Forward pass of LinearBlockSequence.

    conv_features : (B, H*W, C) float32
    layer_params  : list of dicts (torch layout) per _BasicLinear:
                      'weight' (out,in), 'bias' (out,), 'bn_weight' (out,), 'bn_bias' (out,)
    returns       : (B, max_lines, last_out_features // max_lines)
    """
    B = conv_features.shape[0]
    x2d = conv_features.reshape(B, -1)          # same row-major flatten as torch .reshape
    k_in = x2d.shape[1]

    flat_args = []
    flops = 0
    transcendentals = 0
    weight_bytes = 0
    for p in layer_params:
        f_out, f_in = p["weight"].shape
        flat_args += [
            # Torch layout (out, in) cast to bf16 in the wrapper (no transpose,
            # no extra HBM copy; half the weight DMA bytes).
            p["weight"].astype(jnp.bfloat16),
            p["bias"].reshape(1, f_out).astype(jnp.float32),
            p["bn_weight"].reshape(1, f_out).astype(jnp.float32),
            p["bn_bias"].reshape(1, f_out).astype(jnp.float32),
        ]
        flops += 2 * B * f_in * f_out
        transcendentals += f_out              # one rsqrt per output feature
        weight_bytes += f_out * f_in * 2      # bf16
        k_in = f_out
    f_last = k_in

    # TODO(synk): if weight_bytes ever exceeds ~16-24 MiB (much wider/deeper
    # configs), stream one layer's weights at a time (grid axis over layers or
    # manual pltpu.make_async_copy double-buffering) so the kernel fits v7x's
    # 64 MiB VMEM and layer l+1's weight DMA overlaps layer l's compute.
    assert weight_bytes <= _RESIDENT_WEIGHT_BYTES_LIMIT, (
        "all-weights-resident design exceeds VMEM budget; needs per-layer streaming")

    io_bytes = x2d.size * x2d.dtype.itemsize + B * f_last * x2d.dtype.itemsize
    param_bytes = weight_bytes + sum(3 * 4 * p["weight"].shape[0] for p in layer_params)

    n_in = 1 + len(flat_args)
    out2d = pl.pallas_call(
        _make_fused_kernel(len(layer_params)),
        out_shape=jax.ShapeDtypeStruct((B, f_last), conv_features.dtype),
        # Single grid step: every operand is a whole-array VMEM-resident block.
        in_specs=[pl.BlockSpec(memory_space=pltpu.MemorySpace.VMEM)] * n_in,
        out_specs=pl.BlockSpec(memory_space=pltpu.MemorySpace.VMEM),
        cost_estimate=pl.CostEstimate(
            flops=flops,
            transcendentals=transcendentals,
            bytes_accessed=param_bytes + io_bytes),
    )(x2d, *flat_args)

    return out2d.reshape(B, max_lines, f_last // max_lines)


if __name__ == "__main__":
    # Shapes consistent with the module: conv_features [b, h*w, c] with
    # b=2, h=w=8, c=4  ->  in_features = 256; layers 256->256 and 256->128;
    # max_lines=8 -> output (2, 8, 16).
    B, H, W, C = 2, 8, 8, 4
    in_features = H * W * C
    hidden, out_features = 256, 128
    max_lines = 8

    key = jax.random.PRNGKey(0)
    kx, kl = jax.random.split(key, 2)
    x = jax.random.normal(kx, (B, H * W, C), dtype=jnp.float32)

    def make_layer(k, f_in, f_out):
        kw, kb, kg, kbe = jax.random.split(k, 4)
        return dict(
            weight=jax.random.normal(kw, (f_out, f_in), dtype=jnp.float32)
                   * (1.0 / jnp.sqrt(jnp.float32(f_in))),
            bias=0.1 * jax.random.normal(kb, (f_out,), dtype=jnp.float32),
            bn_weight=1.0 + 0.1 * jax.random.normal(kg, (f_out,), dtype=jnp.float32),
            bn_bias=0.1 * jax.random.normal(kbe, (f_out,), dtype=jnp.float32),
        )

    k1, k2 = jax.random.split(kl, 2)
    params = [make_layer(k1, in_features, hidden),
              make_layer(k2, hidden, out_features)]

    y = linear_block_sequence(x, params, max_lines)
    y = jax.block_until_ready(y)

    # Pure-JAX reference mirroring the kernel numerics (bf16 matmul operands,
    # f32 accumulation, training-mode BatchNorm1d, LeakyReLU).
    out = x.reshape(B, -1)
    for p in params:
        out = jnp.dot(out.astype(jnp.bfloat16),
                      p["weight"].astype(jnp.bfloat16).T,
                      preferred_element_type=jnp.float32) + p["bias"]
        mean = out.mean(axis=0, keepdims=True)
        var = jnp.mean((out - mean) ** 2, axis=0, keepdims=True)
        out = (out - mean) * (p["bn_weight"] * lax.rsqrt(var + _BN_EPS)) + p["bn_bias"]
        out = jnp.maximum(out, _LEAKY_SLOPE * out)
    ref = out.reshape(B, max_lines, -1)

    assert y.shape == (B, max_lines, out_features // max_lines)
    assert jnp.allclose(y, ref, atol=2e-3, rtol=2e-3), "mismatch vs reference"

    print("KERNEL_OK")
</pallas_src>

<mosaic_0001>
module attributes {stable_mosaic.version = 11 : i64} {
  func.func @kernel(%arg0: memref<2x256xf32, #tpu.memory_space<vmem>>, %arg1: memref<256x256xbf16, #tpu.memory_space<vmem>>, %arg2: memref<1x256xf32, #tpu.memory_space<vmem>>, %arg3: memref<1x256xf32, #tpu.memory_space<vmem>>, %arg4: memref<1x256xf32, #tpu.memory_space<vmem>>, %arg5: memref<128x256xbf16, #tpu.memory_space<vmem>>, %arg6: memref<1x128xf32, #tpu.memory_space<vmem>>, %arg7: memref<1x128xf32, #tpu.memory_space<vmem>>, %arg8: memref<1x128xf32, #tpu.memory_space<vmem>>, %arg9: memref<2x128xf32, #tpu.memory_space<vmem>>) attributes {dimension_semantics = [], scalar_prefetch = 0 : i64, scratch_operands = 0 : i64, tpu.core_type = #tpu.core_type<tc>} {
    %c0 = arith.constant 0 : index
    %c0_0 = arith.constant 0 : index
    %0 = vector.load %arg0[%c0, %c0_0] : memref<2x256xf32, #tpu.memory_space<vmem>>, vector<2x256xf32>
    %1 = arith.truncf %0 : vector<2x256xf32> to vector<2x256xbf16>
    %c0_1 = arith.constant 0 : index
    %c0_2 = arith.constant 0 : index
    %2 = vector.load %arg1[%c0_1, %c0_2] : memref<256x256xbf16, #tpu.memory_space<vmem>>, vector<256x256xbf16>
    %cst = arith.constant dense<0.000000e+00> : vector<2x256xf32>
    %3 = tpu.matmul %1, %2, %cst {dimension_numbers = #tpu.dot_dimension_numbers<[1], [1], [0], [0], [0, 0, 1, 0], [], []>} : vector<2x256xbf16>, vector<256x256xbf16>, vector<2x256xf32> -> vector<2x256xf32>
    %c0_3 = arith.constant 0 : index
    %c0_4 = arith.constant 0 : index
    %4 = vector.load %arg2[%c0_3, %c0_4] : memref<1x256xf32, #tpu.memory_space<vmem>>, vector<1x256xf32>
    %5 = vector.broadcast %4 : vector<1x256xf32> to vector<2x256xf32>
    %6 = arith.addf %3, %5 : vector<2x256xf32>
    %cst_5 = arith.constant dense<0.000000e+00> : vector<256xf32>
    %7 = vector.multi_reduction <add>, %6, %cst_5 [0] : vector<2x256xf32> to vector<256xf32>
    %8 = vector.shape_cast %7 : vector<256xf32> to vector<1x256xf32>
    %cst_6 = arith.constant 2.000000e+00 : f32
    %9 = vector.broadcast %cst_6 : f32 to vector<1x256xf32>
    %10 = arith.divf %8, %9 : vector<1x256xf32>
    %11 = vector.broadcast %10 : vector<1x256xf32> to vector<2x256xf32>
    %12 = arith.subf %6, %11 : vector<2x256xf32>
    %13 = arith.mulf %12, %12 : vector<2x256xf32>
    %cst_7 = arith.constant dense<0.000000e+00> : vector<256xf32>
    %14 = vector.multi_reduction <add>, %13, %cst_7 [0] : vector<2x256xf32> to vector<256xf32>
    %15 = vector.shape_cast %14 : vector<256xf32> to vector<1x256xf32>
    %cst_8 = arith.constant 2.000000e+00 : f32
    %16 = vector.broadcast %cst_8 : f32 to vector<1x256xf32>
    %17 = arith.divf %15, %16 : vector<1x256xf32>
    %c0_9 = arith.constant 0 : index
    %c0_10 = arith.constant 0 : index
    %18 = vector.load %arg3[%c0_9, %c0_10] : memref<1x256xf32, #tpu.memory_space<vmem>>, vector<1x256xf32>
    %cst_11 = arith.constant 9.99999974E-6 : f32
    %19 = vector.broadcast %cst_11 : f32 to vector<1x256xf32>
    %20 = arith.addf %17, %19 : vector<1x256xf32>
    %21 = math.rsqrt %20 : vector<1x256xf32>
    %22 = arith.mulf %18, %21 : vector<1x256xf32>
    %c0_12 = arith.constant 0 : index
    %c0_13 = arith.constant 0 : index
    %23 = vector.load %arg4[%c0_12, %c0_13] : memref<1x256xf32, #tpu.memory_space<vmem>>, vector<1x256xf32>
    %24 = arith.mulf %10, %22 : vector<1x256xf32>
    %25 = arith.subf %23, %24 : vector<1x256xf32>
    %26 = vector.broadcast %22 : vector<1x256xf32> to vector<2x256xf32>
    %27 = arith.mulf %6, %26 : vector<2x256xf32>
    %28 = vector.broadcast %25 : vector<1x256xf32> to vector<2x256xf32>
    %29 = arith.addf %27, %28 : vector<2x256xf32>
    %cst_14 = arith.constant 0.00999999977 : f32
    %30 = vector.broadcast %cst_14 : f32 to vector<2x256xf32>
    %31 = arith.mulf %30, %29 : vector<2x256xf32>
    %32 = arith.maximumf %29, %31 : vector<2x256xf32>
    %33 = arith.truncf %32 : vector<2x256xf32> to vector<2x256xbf16>
    %c0_15 = arith.constant 0 : index
    %c0_16 = arith.constant 0 : index
    %34 = vector.load %arg5[%c0_15, %c0_16] : memref<128x256xbf16, #tpu.memory_space<vmem>>, vector<128x256xbf16>
    %cst_17 = arith.constant dense<0.000000e+00> : vector<2x128xf32>
    %35 = tpu.matmul %33, %34, %cst_17 {dimension_numbers = #tpu.dot_dimension_numbers<[1], [1], [0], [0], [0, 0, 1, 0], [], []>} : vector<2x256xbf16>, vector<128x256xbf16>, vector<2x128xf32> -> vector<2x128xf32>
    %c0_18 = arith.constant 0 : index
    %c0_19 = arith.constant 0 : index
    %36 = vector.load %arg6[%c0_18, %c0_19] : memref<1x128xf32, #tpu.memory_space<vmem>>, vector<1x128xf32>
    %37 = vector.broadcast %36 : vector<1x128xf32> to vector<2x128xf32>
    %38 = arith.addf %35, %37 : vector<2x128xf32>
    %cst_20 = arith.constant dense<0.000000e+00> : vector<128xf32>
    %39 = vector.multi_reduction <add>, %38, %cst_20 [0] : vector<2x128xf32> to vector<128xf32>
    %40 = vector.shape_cast %39 : vector<128xf32> to vector<1x128xf32>
    %cst_21 = arith.constant 2.000000e+00 : f32
    %41 = vector.broadcast %cst_21 : f32 to vector<1x128xf32>
    %42 = arith.divf %40, %41 : vector<1x128xf32>
    %43 = vector.broadcast %42 : vector<1x128xf32> to vector<2x128xf32>
    %44 = arith.subf %38, %43 : vector<2x128xf32>
    %45 = arith.mulf %44, %44 : vector<2x128xf32>
    %cst_22 = arith.constant dense<0.000000e+00> : vector<128xf32>
    %46 = vector.multi_reduction <add>, %45, %cst_22 [0] : vector<2x128xf32> to vector<128xf32>
    %47 = vector.shape_cast %46 : vector<128xf32> to vector<1x128xf32>
    %cst_23 = arith.constant 2.000000e+00 : f32
    %48 = vector.broadcast %cst_23 : f32 to vector<1x128xf32>
    %49 = arith.divf %47, %48 : vector<1x128xf32>
    %c0_24 = arith.constant 0 : index
    %c0_25 = arith.constant 0 : index
    %50 = vector.load %arg7[%c0_24, %c0_25] : memref<1x128xf32, #tpu.memory_space<vmem>>, vector<1x128xf32>
    %cst_26 = arith.constant 9.99999974E-6 : f32
    %51 = vector.broadcast %cst_26 : f32 to vector<1x128xf32>
    %52 = arith.addf %49, %51 : vector<1x128xf32>
    %53 = math.rsqrt %52 : vector<1x128xf32>
    %54 = arith.mulf %50, %53 : vector<1x128xf32>
    %c0_27 = arith.constant 0 : index
    %c0_28 = arith.constant 0 : index
    %55 = vector.load %arg8[%c0_27, %c0_28] : memref<1x128xf32, #tpu.memory_space<vmem>>, vector<1x128xf32>
    %56 = arith.mulf %42, %54 : vector<1x128xf32>
    %57 = arith.subf %55, %56 : vector<1x128xf32>
    %58 = vector.broadcast %54 : vector<1x128xf32> to vector<2x128xf32>
    %59 = arith.mulf %38, %58 : vector<2x128xf32>
    %60 = vector.broadcast %57 : vector<1x128xf32> to vector<2x128xf32>
    %61 = arith.addf %59, %60 : vector<2x128xf32>
    %cst_29 = arith.constant 0.00999999977 : f32
    %62 = vector.broadcast %cst_29 : f32 to vector<2x128xf32>
    %63 = arith.mulf %62, %61 : vector<2x128xf32>
    %64 = arith.maximumf %61, %63 : vector<2x128xf32>
    %c0_30 = arith.constant 0 : index
    %c0_31 = arith.constant 0 : index
    %65 = vector.load %arg9[%c0_30, %c0_31] : memref<2x128xf32, #tpu.memory_space<vmem>>, vector<2x128xf32>
    tpu.vector_store %arg9[%c0_30, %c0_31], %64 {strides = array<i32>} : memref<2x128xf32, #tpu.memory_space<vmem>>, vector<2x128xf32>,
    return
  }
}

</mosaic_0001>

<bundles_post_ra>
// kernel: tpu_custom_call.1
= control target key start
LH: loop header
LB: loop body
LE: loop exit
PB: predicated region body
PF: predicated region fallthrough
CT: control target
= control target key end

     0   :  { %14 = vsyncpa [#allocation3], 0  ;;  %s1025_s0 = inlined_call_operand.hbm [shape: f32[2,256], index: 0, kind: input, shape index: {}]   ;;  %s1026_s1 = inlined_call_operand.hbm [shape: bf16[256,256], index: 1, kind: input, shape index: {}]   ;;  %s1027_s2 = inlined_call_operand.vmem [shape: f32[1,256], index: 2, kind: input, shape index: {}]   ;;  %s1028_s3 = inlined_call_operand.vmem [shape: f32[1,256], index: 3, kind: input, shape index: {}]   ;;  %s1029_s4 = inlined_call_operand.vmem [shape: f32[1,256], index: 4, kind: input, shape index: {}]   ;;  %s1030_s5 = inlined_call_operand.hbm [shape: bf16[128,256], index: 5, kind: input, shape index: {}]   ;;  %s1031_s6 = inlined_call_operand.vmem [shape: f32[1,128], index: 6, kind: input, shape index: {}]   ;;  %s1032_s7 = inlined_call_operand.vmem [shape: f32[1,128], index: 7, kind: input, shape index: {}]   ;;  %s1033_s8 = inlined_call_operand.vmem [shape: f32[1,128], index: 8, kind: input, shape index: {}]   ;;  %s1034_s9 = inlined_call_operand.hbm [shape: f32[2,128], index: 9, kind: output, shape index: {}]  }
   0x1   :  { %15 = vsyncpa [#allocation6], 0 }
   0x2   :  { %16 = vsyncpa [#allocation4], 0  ;;  %s878_s30 = smov [#allocation5]   ;;  %s784_s13 = scalar_lea.hbm %s1026_s1, 4096 }
   0x3   :  { %s32_s10 = sshll.u32 %s878_s30, 4  ;;  %p785_p0 = scmp.ne.s32.totalorder %s1026_s1, %s784_s13  ;;  %s33_s10 = int_to_ptr.vmem [resolvable:$true] %s32_s10 }
   0x4   :  { %p788_p1 = scmp.lt.u32.totalorder %s784_s13, %s1026_s1 }
   0x6   :  { %p790_p2 = pnand %p788_p1, %p785_p0 }
   0x8   :  { %793 = shalt.err (!%p790_p2)
}
   0x9   :  { %s794_s18 = scalar_lea.vmem %s33_s10, 4096  ;;  %p799_p4 = scmp.lt.s32.totalorder %s33_s10, %s33_s10 }
   0xa   :  { %p795_p3 = scmp.ne.s32.totalorder %s33_s10, %s794_s18  ;;  %p800_p5 = scmp.lt.s32.totalorder %s794_s18, %s794_s18 }
   0xc   :  { %p801_p6 = por %p800_p5, %p799_p4 }
   0xe   :  { %p802_p7 = pnand %p801_p6, %p795_p3 }
  0x10   :  { %805 = shalt.err (!%p802_p7)
}
  0x11   :  { %s879_s19 = smov 128   ;;  %s880_s20 = smov 8  }
  0x12   :  { %38 = dma.hbm_to_vmem [thread:$0]  %s1026_s1, 4096, %s33_s10, [#allocation6], %s879_s19, %s879_s19, %s880_s20  }
  0x13   :  { %s881_s23 = smov [#allocation2]   ;;  %s882_s25 = smov [#allocation7]  }
  0x14   :  { %s23_s24 = sshll.u32 %s881_s23, 4  ;;  %s50_s26 = sshll.u32 %s882_s25, 4  ;;  %s24_s24 = int_to_ptr.vmem [resolvable:$true] %s23_s24  ;;  %s51_s26 = int_to_ptr.vmem [resolvable:$true] %s50_s26 }
  0x15   :  { %s806_s29 = scalar_lea.hbm %s1025_s0, 64 }
  0x16   :  { %p807_p8 = scmp.ne.s32.totalorder %s1025_s0, %s806_s29  ;;  %p810_p9 = scmp.lt.u32.totalorder %s806_s29, %s1025_s0 }
  0x18   :  { %p812_p10 = pnand %p810_p9, %p807_p8 }
  0x1a   :  { %815 = shalt.err (!%p812_p10)
}
  0x1b   :  { %s816_s1 = scalar_lea.vmem %s24_s24, 64  ;;  %p821_p12 = scmp.lt.s32.totalorder %s24_s24, %s24_s24 }
  0x1c   :  { %p817_p11 = scmp.ne.s32.totalorder %s24_s24, %s816_s1  ;;  %p822_p13 = scmp.lt.s32.totalorder %s816_s1, %s816_s1 }
  0x1e   :  { %p823_p0 = por %p822_p13, %p821_p12 }
  0x20   :  { %p824_p1 = pnand %p823_p0, %p817_p11 }
  0x22   :  { %827 = shalt.err (!%p824_p1)
}
  0x23   :  { %26 = dma.hbm_to_vmem [thread:$0]  %s1025_s0, 64, %s24_s24, [#allocation3]  }
  0x24   :  { %s828_s17 = scalar_lea.hbm %s1030_s5, 2048 }
  0x25   :  { %p829_p2 = scmp.ne.s32.totalorder %s1030_s5, %s828_s17  ;;  %p832_p3 = scmp.lt.u32.totalorder %s828_s17, %s1030_s5 }
  0x27   :  { %p834_p4 = pnand %p832_p3, %p829_p2 }
  0x29   :  { %837 = shalt.err (!%p834_p4)
}
  0x2a   :  { %s838_s25 = scalar_lea.vmem %s51_s26, 2048  ;;  %p843_p6 = scmp.lt.s32.totalorder %s51_s26, %s51_s26 }
  0x2b   :  { %p839_p5 = scmp.ne.s32.totalorder %s51_s26, %s838_s25  ;;  %p844_p7 = scmp.lt.s32.totalorder %s838_s25, %s838_s25 }
  0x2d   :  { %p845_p8 = por %p844_p7, %p843_p6 }
  0x2f   :  { %p846_p9 = pnand %p845_p8, %p839_p5 }
  0x31   :  { %849 = shalt.err (!%p846_p9)
}
  0x32   :  { %56 = dma.hbm_to_vmem [thread:$0]  %s1030_s5, 2048, %s51_s26, [#allocation6], %s879_s19, %s879_s19, %s880_s20  }
  0x33   :  { %872 = dma.done.wait [#allocation3], 64  }
  0x34   :  { %873 = vsyncadd [#allocation3], 4294967232 }
  0x35   :  { %874 = dma.done.wait [#allocation6], 6144  }
  0x36   :  { %875 = vsyncadd [#allocation6], 4294961152  ;;  %v706_v0 = vld [vmem:[#allocation5 + $0x4] ss:$8 sps:$4 sm:$0xff]   ;;  %v708_v1 = vld [vmem:[#allocation5] ss:$8 sps:$4 sm:$0xff]   ;;  %v121_v52 = vlaneseq }
  0x37   :  { %291 = vmatprep.subr.bf16.mxu0 %v706_v0  ;;  %v709_v2 = vld [vmem:[#allocation5 + $0x14] ss:$8 sps:$4 sm:$0xff]   ;;  %v711_v3 = vld [vmem:[#allocation5 + $0x10] ss:$8 sps:$4 sm:$0xff]   ;;  %v712_v4 = vld [vmem:[#allocation5 + $0x24] ss:$8 sps:$4 sm:$0xff]  }
  0x38   :  { %292 = vmatpush1.bf16.xpose.msra.mxu0 %v708_v1  ;;  %v714_v5 = vld [vmem:[#allocation5 + $0x20] ss:$8 sps:$4 sm:$0xff]   ;;  %v715_v6 = vld [vmem:[#allocation5 + $0x34] ss:$8 sps:$4 sm:$0xff]   ;;  %v717_v7 = vld [vmem:[#allocation5 + $0x30] ss:$8 sps:$4 sm:$0xff]  }
  0x39   :  { %293 = vmatprep.subr.bf16.mxu0 %v709_v2  ;;  %v649_v8 = vld.sshfl [vmem:[#allocation2] sm:$0x33 pattern:$0x76325410]  ;;  %v718_v9 = vld [vmem:[#allocation5 + $0x44] ss:$8 sps:$4 sm:$0xff]  }
  0x3a   :  { %v82_v10 = vcombine.high %v649_v8, %v649_v8  ;;  %v720_v12 = vld [vmem:[#allocation5 + $0x40] ss:$8 sps:$4 sm:$0xff]   ;;  %v721_v13 = vld [vmem:[#allocation5 + $0x54] ss:$8 sps:$4 sm:$0xff]   ;;  %v723_v14 = vld [vmem:[#allocation5 + $0x50] ss:$8 sps:$4 sm:$0xff]   ;;  %v85_v35 = vpack.c.bf16 %v649_v8, %v649_v8 }
  0x3b   :  { %v724_v15 = vld [vmem:[#allocation5 + $0x64] ss:$8 sps:$4 sm:$0xff]   ;;  %v726_v16 = vld [vmem:[#allocation5 + $0x60] ss:$8 sps:$4 sm:$0xff]   ;;  %v727_v17 = vld [vmem:[#allocation5 + $0x74] ss:$8 sps:$4 sm:$0xff]  }
  0x3c   :  { %v86_v11 = vpack.c.bf16 %v82_v10, %v82_v10  ;;  %v729_v18 = vld [vmem:[#allocation5 + $0x70] ss:$8 sps:$4 sm:$0xff]   ;;  %v730_v19 = vld [vmem:[#allocation5 + $0x84] ss:$8 sps:$4 sm:$0xff]   ;;  %v732_v20 = vld [vmem:[#allocation5 + $0x80] ss:$8 sps:$4 sm:$0xff]  }
  0x3d   :  { %v733_v21 = vld [vmem:[#allocation5 + $0x94] ss:$8 sps:$4 sm:$0xff]   ;;  %v735_v22 = vld [vmem:[#allocation5 + $0x90] ss:$8 sps:$4 sm:$0xff]   ;;  %v736_v23 = vld [vmem:[#allocation5 + $0xa4] ss:$8 sps:$4 sm:$0xff]  }
  0x3e   :  { %323 = vmatprep.mubr.bf16.mxu0 %v86_v11  ;;  %v738_v24 = vld [vmem:[#allocation5 + $0xa0] ss:$8 sps:$4 sm:$0xff]   ;;  %v739_v25 = vld [vmem:[#allocation5 + $0xb4] ss:$8 sps:$4 sm:$0xff]   ;;  %v741_v26 = vld [vmem:[#allocation5 + $0xb0] ss:$8 sps:$4 sm:$0xff]  }
  0x3f   :  { %v742_v27 = vld [vmem:[#allocation5 + $0xc4] ss:$8 sps:$4 sm:$0xff]   ;;  %v744_v28 = vld [vmem:[#allocation5 + $0xc0] ss:$8 sps:$4 sm:$0xff]   ;;  %v745_v29 = vld [vmem:[#allocation5 + $0xd4] ss:$8 sps:$4 sm:$0xff]  }
  0x40   :  { %294 = vmatpush1.bf16.xpose.msra.mxu0 %v711_v3  ;;  %v747_v30 = vld [vmem:[#allocation5 + $0xd0] ss:$8 sps:$4 sm:$0xff]   ;;  %v748_v31 = vld [vmem:[#allocation5 + $0xe4] ss:$8 sps:$4 sm:$0xff]   ;;  %v750_v32 = vld [vmem:[#allocation5 + $0xe0] ss:$8 sps:$4 sm:$0xff]  }
  0x41   :  { %295 = vmatprep.subr.bf16.mxu0 %v712_v4  ;;  %v751_v33 = vld [vmem:[#allocation5 + $0xf4] ss:$8 sps:$4 sm:$0xff]   ;;  %v753_v34 = vld [vmem:[#allocation5 + $0xf0] ss:$8 sps:$4 sm:$0xff]   ;;  %v754_v36 = vld [vmem:[#allocation7 + $0x4] ss:$8 sps:$4 sm:$0xff]  }
  0x42   :  { %v756_v37 = vld [vmem:[#allocation7] ss:$8 sps:$4 sm:$0xff]   ;;  %551 = vmatprep.subr.bf16.mxu1 %v754_v36  ;;  %v757_v38 = vld [vmem:[#allocation7 + $0x14] ss:$8 sps:$4 sm:$0xff]   ;;  %v759_v39 = vld [vmem:[#allocation7 + $0x10] ss:$8 sps:$4 sm:$0xff]  }
  0x43   :  { %552 = vmatpush1.bf16.xpose.msra.mxu1 %v756_v37  ;;  %v760_v40 = vld [vmem:[#allocation7 + $0x24] ss:$8 sps:$4 sm:$0xff]   ;;  %v762_v41 = vld [vmem:[#allocation7 + $0x20] ss:$8 sps:$4 sm:$0xff]   ;;  %v763_v42 = vld [vmem:[#allocation7 + $0x34] ss:$8 sps:$4 sm:$0xff]  }
  0x44   :  { %553 = vmatprep.subr.bf16.mxu1 %v757_v38  ;;  %v765_v43 = vld [vmem:[#allocation7 + $0x30] ss:$8 sps:$4 sm:$0xff]   ;;  %v766_v44 = vld [vmem:[#allocation7 + $0x44] ss:$8 sps:$4 sm:$0xff]   ;;  %v768_v45 = vld [vmem:[#allocation7 + $0x40] ss:$8 sps:$4 sm:$0xff]  }
  0x45   :  { %v769_v46 = vld [vmem:[#allocation7 + $0x54] ss:$8 sps:$4 sm:$0xff]   ;;  %v771_v47 = vld [vmem:[#allocation7 + $0x50] ss:$8 sps:$4 sm:$0xff]   ;;  %v772_v48 = vld [vmem:[#allocation7 + $0x64] ss:$8 sps:$4 sm:$0xff]  }
  0x46   :  { %v774_v49 = vld [vmem:[#allocation7 + $0x60] ss:$8 sps:$4 sm:$0xff]   ;;  %v775_v50 = vld [vmem:[#allocation7 + $0x74] ss:$8 sps:$4 sm:$0xff]   ;;  %v777_v51 = vld [vmem:[#allocation7 + $0x70] ss:$8 sps:$4 sm:$0xff]  }
  0x47   :  { %v122_v53 = vshrl.u32 %v121_v52, 7  ;;  %v119_v55 = vld [vmem:[%s1027_s2] sm:$0x3]  ;;  %vm332_vm0 = vcmask 1041408   ;;  %s884_s11 = smov [#allocation8]  }
  0x48   :  { %296 = vmatpush1.bf16.xpose.msra.mxu0 %v714_v5  ;;  %s639_s12 = sshll.u32 %s884_s11, 4  ;;  %s640_s12 = int_to_ptr.vmem [resolvable:$true] %s639_s12 }
  0x49   :  { %297 = vmatprep.subr.bf16.mxu0 %v715_v6  ;;  %v977_v54 = vsub.s32 0, %v122_v53  ;;  %v982_v56 = vsub.s32 1, %v122_v53  ;;  %p855_p11 = scmp.lt.s32.totalorder %s640_s12, %s640_s12 }
  0x4b   :  { %554 = vmatpush1.bf16.xpose.msra.mxu1 %v759_v39  ;;  %v124_v57 = vrot.slane %v119_v55, %v977_v54  ;;  %v128_v58 = vrot.slane %v119_v55, %v982_v56  ;;  %v883_v39 = vmov 1966171168  }
  0x4c   :  { %555 = vmatprep.subr.bf16.mxu1 %v760_v40  ;;  %v379_v40 = vunpack.c.l.s4 %v883_v39 }
  0x50   :  { %298 = vmatpush1.bf16.xpose.msra.mxu0 %v717_v7 }
  0x51   :  { %299 = vmatprep.subr.bf16.mxu0 %v718_v9 }
  0x53   :  { %556 = vmatpush1.bf16.xpose.msra.mxu1 %v762_v41  ;;  %v380_v41 = vunpack.c.0.s8 %v379_v40 }
  0x54   :  { %557 = vmatprep.subr.bf16.mxu1 %v763_v42 }
  0x58   :  { %300 = vmatpush1.bf16.xpose.msra.mxu0 %v720_v12 }
  0x59   :  { %301 = vmatprep.subr.bf16.mxu0 %v721_v13 }
  0x5b   :  { %558 = vmatpush1.bf16.xpose.msra.mxu1 %v765_v43  ;;  %v383_v43 = vsub.s32 %v380_v41, %v122_v53  ;;  %v394_v53 = vld [vmem:[%s1029_s4] sm:$0x3] }
  0x5c   :  { %559 = vmatprep.subr.bf16.mxu1 %v766_v44 }
  0x60   :  { %302 = vmatpush1.bf16.xpose.msra.mxu0 %v723_v14 }
  0x61   :  { %303 = vmatprep.subr.bf16.mxu0 %v724_v15 }
  0x63   :  { %560 = vmatpush1.bf16.xpose.msra.mxu1 %v768_v45 }
  0x64   :  { %561 = vmatprep.subr.bf16.mxu1 %v769_v46 }
  0x68   :  { %304 = vmatpush1.bf16.xpose.msra.mxu0 %v726_v16 }
  0x69   :  { %305 = vmatprep.subr.bf16.mxu0 %v727_v17 }
  0x6b   :  { %562 = vmatpush1.bf16.xpose.msra.mxu1 %v771_v47  ;;  %v370_v47 = vld [vmem:[%s1028_s3] sm:$0x3] }
  0x6c   :  { %563 = vmatprep.subr.bf16.mxu1 %v772_v48 }
  0x70   :  { %306 = vmatpush1.bf16.xpose.msra.mxu0 %v729_v18 }
  0x71   :  { %307 = vmatprep.subr.bf16.mxu0 %v730_v19 }
  0x73   :  { %564 = vmatpush1.bf16.xpose.msra.mxu1 %v774_v49 }
  0x74   :  { %565 = vmatprep.subr.bf16.mxu1 %v775_v50 }
  0x78   :  { %308 = vmatpush1.bf16.xpose.msra.mxu0 %v732_v20 }
  0x79   :  { %309 = vmatprep.subr.bf16.mxu0 %v733_v21 }
  0x7b   :  { %566 = vmatpush1.bf16.xpose.msra.mxu1 %v777_v51 }
  0x80   :  { %310 = vmatpush1.bf16.xpose.msra.mxu0 %v735_v22 }
  0x81   :  { %311 = vmatprep.subr.bf16.mxu0 %v736_v23 }
  0x88   :  { %312 = vmatpush1.bf16.xpose.msra.mxu0 %v738_v24 }
  0x89   :  { %313 = vmatprep.subr.bf16.mxu0 %v739_v25 }
  0x90   :  { %314 = vmatpush1.bf16.xpose.msra.mxu0 %v741_v26 }
  0x91   :  { %315 = vmatprep.subr.bf16.mxu0 %v742_v27 }
  0x98   :  { %316 = vmatpush1.bf16.xpose.msra.mxu0 %v744_v28 }
  0x99   :  { %317 = vmatprep.subr.bf16.mxu0 %v745_v29 }
  0xa0   :  { %318 = vmatpush1.bf16.xpose.msra.mxu0 %v747_v30 }
  0xa1   :  { %319 = vmatprep.subr.bf16.mxu0 %v748_v31 }
  0xa8   :  { %320 = vmatpush1.bf16.xpose.msra.mxu0 %v750_v32 }
  0xa9   :  { %321 = vmatprep.subr.bf16.mxu0 %v751_v33 }
  0xb0   :  { %322 = vmatpush1.bf16.xpose.msra.mxu0 %v753_v34 }
  0xb7   :  { %324 = vmatmul.mubr.bf16.vlgmr.msra.gmra.mrb[0].mxu0 %v85_v35 }
 0x18a   :  { %v325_v59 = vpop.f32.mrb[0].mxu0 }
 0x18b   :  { %v326_v60 = vadd.f32 %v325_v59, %v124_v57  ;;  %v327_v61 = vpop.f32.mrb[1].mxu0 }
 0x18c   :  { %v328_v62 = vadd.f32 %v327_v61, %v128_v58  ;;  %v329_v63 = vpop.f32.mrb[2].mxu0 }
 0x18d   :  { %v333_v0 = vsel %vm332_vm0, %v326_v60, 0.0  ;;  %v330_v1 = vpop.f32.mrb[3].mxu0 }
 0x18e   :  { %v334_v2 = vrot.slane %v333_v0, 4  ;;  %v340_v3 = vsel %vm332_vm0, %v328_v62, 0.0 }
 0x18f   :  { %v341_v4 = vrot.slane %v340_v3, 4 }
 0x190   :  { %v335_v5 = vadd.f32 %v334_v2, %v333_v0 }
 0x191   :  { %v342_v6 = vadd.f32 %v341_v4, %v340_v3 }
 0x192   :  { %v336_v7 = vrot.slane %v335_v5, 2 }
 0x193   :  { %v343_v8 = vrot.slane %v342_v6, 2 }
 0x194   :  { %v337_v9 = vadd.f32 %v336_v7, %v335_v5 }
 0x195   :  { %v344_v10 = vadd.f32 %v343_v8, %v342_v6 }
 0x196   :  { %v338_v11 = vrot.slane %v337_v9, 1 }
 0x197   :  { %v345_v12 = vrot.slane %v344_v10, 1 }
 0x198   :  { %v339_v13 = vadd.f32 %v338_v11, %v337_v9  ;;  %v682_v9 = vld [vmem:[%s1031_s6] ss:$0 sm:$0xff] }
 0x199   :  { %v346_v14 = vadd.f32 %v345_v12, %v344_v10 }
 0x19a   :  { %v348_v15 = vmul.f32 0.5, %v339_v13 }
 0x19b   :  { %v349_v16 = vmul.f32 0.5, %v346_v14 }
 0x19c   :  { %v350_v17 = vsub.f32 %v326_v60, %v348_v15 }
 0x19d   :  { %v351_v18 = vsub.f32 %v328_v62, %v349_v16 }
 0x19e   :  { %v352_v19 = vmul.f32 %v350_v17, %v350_v17 }
 0x19f   :  { %v353_v20 = vmul.f32 %v351_v18, %v351_v18 }
 0x1a0   :  { %v354_v21 = vsel %vm332_vm0, %v352_v19, 0.0 }
 0x1a1   :  { %v355_v22 = vrot.slane %v354_v21, 4  ;;  %v361_v23 = vsel %vm332_vm0, %v353_v20, 0.0 }
 0x1a2   :  { %v362_v24 = vrot.slane %v361_v23, 4 }
 0x1a3   :  { %v356_v25 = vadd.f32 %v355_v22, %v354_v21 }
 0x1a4   :  { %v363_v26 = vadd.f32 %v362_v24, %v361_v23 }
 0x1a5   :  { %v357_v27 = vrot.slane %v356_v25, 2 }
 0x1a6   :  { %v364_v28 = vrot.slane %v363_v26, 2 }
 0x1a7   :  { %v358_v29 = vadd.f32 %v357_v27, %v356_v25 }
 0x1a8   :  { %v365_v30 = vadd.f32 %v364_v28, %v363_v26 }
 0x1a9   :  { %v359_v31 = vrot.slane %v358_v29, 1 }
 0x1aa   :  { %v366_v32 = vrot.slane %v365_v30, 1 }
 0x1ab   :  { %v360_v33 = vadd.f32 %v359_v31, %v358_v29 }
 0x1ac   :  { %v367_v34 = vadd.f32 %v366_v32, %v365_v30 }
 0x1ad   :  { %v368_v35 = vmul.f32 0.5, %v360_v33  ;;  %v609_v33 = vld [vmem:[%s1032_s7] sm:$0x1]  ;;  %s850_s7 = scalar_lea.vmem %s640_s12, 32 }
 0x1ae   :  { %v369_v36 = vmul.f32 0.5, %v367_v34  ;;  %p851_p10 = scmp.ne.s32.totalorder %s640_s12, %s850_s7  ;;  %p856_p12 = scmp.lt.s32.totalorder %s850_s7, %s850_s7 }
 0x1af   :  { %v371_v37 = vadd.f32 1e-05, %v368_v35 }
 0x1b0   :  { %v372_v38 = vadd.f32 1e-05, %v369_v36  ;;  %v613_v36 = vld [vmem:[%s1033_s8] sm:$0x1]  ;;  %p857_p13 = por %p856_p12, %p855_p11 }
 0x1b1   :  { %778 = vrsqrt.f32 %v371_v37 }
 0x1b2   :  { %780 = vrsqrt.f32 %v372_v38  ;;  %p858_p0 = pnand %p857_p13, %p851_p10 }
 0x1bb   :  { %v779_v42 = vpop.eup %778 }
 0x1bc   :  { %v781_v44 = vpop.eup %780 }
 0x1bd   :  { %v377_v45 = vcombine.low %v779_v42, %v781_v44 }
 0x1bf   :  { %v384_v46 = vrot.slane %v377_v45, %v383_v43 }
 0x1c1   :  { %v391_v48 = vrot.slane %v384_v46, %v383_v43 }
 0x1c3   :  { %v393_v49 = vmul.f32 %v391_v48, %v370_v47 }
 0x1c5   :  { %v399_v50 = vrot.slane %v393_v49, %v977_v54  ;;  %v403_v51 = vrot.slane %v393_v49, %v982_v56 }
 0x1c7   :  { %v406_v52 = vmul.f32 %v399_v50, %v348_v15  ;;  %v407_v55 = vmul.f32 %v403_v51, %v349_v16  ;;  %v428_v57 = vmul.f32 %v403_v51, %v328_v62  ;;  %v427_v58 = vmul.f32 %v399_v50, %v326_v60 }
 0x1c9   :  { %v410_v59 = vcombine.low %v406_v52, %v407_v55 }
 0x1cb   :  { %v417_v61 = vrot.slane %v410_v59, %v383_v43 }
 0x1cd   :  { %v424_v63 = vrot.slane %v417_v61, %v383_v43 }
 0x1cf   :  { %v426_v0 = vsub.f32 %v394_v53, %v424_v63 }
 0x1d1   :  { %v437_v1 = vrot.slane %v426_v0, %v982_v56  ;;  %v433_v2 = vrot.slane %v426_v0, %v977_v54 }
 0x1d3   :  { %v441_v3 = vadd.f32 %v437_v1, %v428_v57  ;;  %v440_v4 = vadd.f32 %v433_v2, %v427_v58 }
 0x1d5   :  { %v443_v5 = vmul.f32 0.01, %v441_v3  ;;  %v442_v6 = vmul.f32 0.01, %v440_v4 }
 0x1d7   :  { %v445_v7 = vmax.f32 %v441_v3, %v443_v5  ;;  %v444_v8 = vmax.f32 %v440_v4, %v442_v6 }
 0x1d9   :  { %v447_v62 = vpack.c.bf16 %v445_v7, %v445_v7  ;;  %v446_v60 = vpack.c.bf16 %v444_v8, %v444_v8 }
 0x1db   :  { %583 = vmatprep.mubr.bf16.mxu1 %v447_v62 }
 0x1dc   :  { %584 = vmatmul.mubr.bf16.vlgmr.msra.gmra.mrb[0].mxu1 %v446_v60 }
 0x2af   :  { %v585_v10 = vpop.f32.mrb[0].mxu1 }
 0x2b0   :  { %v586_v11 = vadd.f32 %v682_v9, %v585_v10  ;;  %v587_v12 = vpop.f32.mrb[1].mxu1 }
 0x2b1   :  { %v588_v56 = vpop.f32.mrb[2].mxu1 }
 0x2b2   :  { %v591_v13 = vsel %vm332_vm0, %v586_v11, 0.0  ;;  %v589_v14 = vpop.f32.mrb[3].mxu1 }
 0x2b3   :  { %v592_v15 = vrot.slane %v591_v13, 4 }
 0x2b5   :  { %v593_v16 = vadd.f32 %v592_v15, %v591_v13 }
 0x2b7   :  { %v594_v17 = vrot.slane %v593_v16, 2 }
 0x2b9   :  { %v595_v18 = vadd.f32 %v594_v17, %v593_v16 }
 0x2bb   :  { %v596_v19 = vrot.slane %v595_v18, 1 }
 0x2bd   :  { %v597_v20 = vadd.f32 %v596_v19, %v595_v18 }
 0x2bf   :  { %v598_v21 = vmul.f32 0.5, %v597_v20 }
 0x2c1   :  { %v599_v22 = vsub.f32 %v586_v11, %v598_v21 }
 0x2c3   :  { %v600_v23 = vmul.f32 %v599_v22, %v599_v22 }
 0x2c5   :  { %v601_v24 = vsel %vm332_vm0, %v600_v23, 0.0 }
 0x2c6   :  { %v602_v25 = vrot.slane %v601_v24, 4 }
 0x2c8   :  { %v603_v26 = vadd.f32 %v602_v25, %v601_v24 }
 0x2ca   :  { %v604_v27 = vrot.slane %v603_v26, 2 }
 0x2cc   :  { %v605_v28 = vadd.f32 %v604_v27, %v603_v26 }
 0x2ce   :  { %v606_v29 = vrot.slane %v605_v28, 1 }
 0x2d0   :  { %v607_v30 = vadd.f32 %v606_v29, %v605_v28 }
 0x2d2   :  { %v608_v31 = vmul.f32 0.5, %v607_v30 }
 0x2d4   :  { %v610_v32 = vadd.f32 1e-05, %v608_v31 }
 0x2d6   :  { %782 = vrsqrt.f32 %v610_v32 }
 0x2e0   :  { %v783_v34 = vpop.eup %782 }
 0x2e1   :  { %v612_v35 = vmul.f32 %v783_v34, %v609_v33 }
 0x2e3   :  { %v614_v37 = vmul.f32 %v612_v35, %v598_v21  ;;  %v620_v38 = vrot.slane %v612_v35, %v977_v54 }
 0x2e5   :  { %v615_v39 = vsub.f32 %v613_v36, %v614_v37  ;;  %v622_v40 = vmul.f32 %v620_v38, %v586_v11 }
 0x2e7   :  { %v627_v41 = vrot.slane %v615_v39, %v977_v54 }
 0x2e9   :  { %v629_v42 = vadd.f32 %v627_v41, %v622_v40 }
 0x2eb   :  { %v630_v43 = vmul.f32 0.01, %v629_v42 }
 0x2ed   :  { %v631_v44 = vmax.f32 %v629_v42, %v630_v43 }
 0x2ef   :  { %632 = vst [vmem:[#allocation8] sm:$0x3] %v631_v44 }
 0x2f0   :  { %861 = shalt.err (!%p858_p0)
}
 0x2f1   :  { %s862_s1 = scalar_lea.hbm %s1034_s9, 32 }
 0x2f2   :  { %p863_p1 = scmp.ne.s32.totalorder %s1034_s9, %s862_s1  ;;  %p866_p2 = scmp.lt.u32.totalorder %s862_s1, %s1034_s9 }
 0x2f4   :  { %p868_p3 = pnand %p866_p2, %p863_p1 }
 0x2f6   :  { %871 = shalt.err (!%p868_p3)
}
 0x2f7   :  { %642 = dma.vmem_to_hbm [thread:$0]  %s640_s12, 32, %s1034_s9, [#allocation4]  }
 0x2f8   :  { %876 = dma.done.wait [#allocation4], 32  }
 0x2f9   :  { %877 = vsyncadd [#allocation4], 4294967264 }
 0x2fa   :  { %646 = vsyncpa [#allocation3], 1 }
 0x2fb   :  { %647 = vsyncpa [#allocation6], 1 }
 0x2fc   :  { %648 = vsyncpa [#allocation4], 1 }

</bundles_post_ra>
